<compile_context>
chip_gen: v6e
topology: v6e:2x2x1
jax: 0.10.0
libtpu: 0.0.40
codegen_flags: <defaults>
</compile_context>

<pallas_src>
import functools

import jax
import jax.numpy as jnp
from jax import lax
from jax.experimental import pallas as pl
from jax.experimental.pallas import tpu as pltpu

EPS = 1e-5
LANE = 128
SUBLANE = 8


def _round_up(n, m=LANE):
    return ((n + m - 1) // m) * m


def _mlp_kernel(x_ref, w1_ref, w2_ref, w3_ref, p_ref, o_ref, *, nh_p, no_p):
    # x_ref : (B, ni_p)  bf16       w1_ref : (ni_p, nh_p) bf16
    # w2_ref: (nh_p, nh_p) bf16     w3_ref : (nh_p, no_p) bf16
    # p_ref : (8, max(nh_p, no_p)) f32 slab
    #         rows 0..5 = b1, g1, be1, b2, g2, be2  (width nh_p)
    #         row  6    = b3                        (width no_p), row 7 = pad
    p = p_ref[...]
    b1, g1, be1 = p[0:1, :nh_p], p[1:2, :nh_p], p[2:3, :nh_p]
    b2, g2, be2 = p[3:4, :nh_p], p[4:5, :nh_p], p[5:6, :nh_p]
    b3 = p[6:7, :no_p]

    def linear_relu_bn(xin, w_ref, b, g, be):
        # Linear (MXU, bf16 inputs, f32 accumulation) + ReLU.
        h = jnp.dot(xin, w_ref[...], preferred_element_type=jnp.float32) + b
        h = jnp.maximum(h, 0.0)
        # BatchNorm1d with batch statistics (PyTorch training-mode default),
        # biased variance, two-pass for accuracy; folded into sub*scale+shift.
        mean = jnp.mean(h, axis=0, keepdims=True)
        d = h - mean
        var = jnp.mean(d * d, axis=0, keepdims=True)
        s = g * lax.rsqrt(var + EPS)                    # per-feature scale
        return d * s + be

    h = linear_relu_bn(x_ref[...], w1_ref, b1, g1, be1)
    h = linear_relu_bn(h.astype(jnp.bfloat16), w2_ref, b2, g2, be2)

    z = jnp.dot(h.astype(jnp.bfloat16), w3_ref[...],
                preferred_element_type=jnp.float32) + b3
    # sigmoid(z) = 0.5*tanh(0.5*z) + 0.5 : single EUP transcendental, exact.
    o_ref[...] = 0.5 * jnp.tanh(0.5 * z) + 0.5


def prepare_params(params):
    """One-time parameter prep (padding, bf16 casts, slab packing). Hoisted
    out of the per-call forward path."""
    n_in, n_hidden = params["w1"].shape
    n_out = params["w3"].shape[1]
    ni_p, nh_p, no_p = _round_up(n_in), _round_up(n_hidden), _round_up(n_out)
    slab_w = max(nh_p, no_p)

    def pad2(a, rows, cols):
        return jnp.pad(a, ((0, rows - a.shape[0]), (0, cols - a.shape[1])))

    # Zero padding is exact: padded hidden features stay identically 0 through
    # ReLU and BN (gamma/beta pad = 0), and padded weight rows are 0.
    w1 = pad2(params["w1"], ni_p, nh_p).astype(jnp.bfloat16)
    w2 = pad2(params["w2"], nh_p, nh_p).astype(jnp.bfloat16)
    w3 = pad2(params["w3"], nh_p, no_p).astype(jnp.bfloat16)

    slab = jnp.zeros((8, slab_w), jnp.float32)
    rows = [params["b1"], params["g1"], params["be1"],
            params["b2"], params["g2"], params["be2"], params["b3"]]
    for i, r in enumerate(rows):
        slab = slab.at[i, :r.shape[1]].set(r[0])

    return dict(w1=w1, w2=w2, w3=w3, slab=slab,
                dims=(n_in, n_hidden, n_out), pdims=(ni_p, nh_p, no_p))


def mnist_model_forward(x, prep):
    """x: (G, B, n_in) f32 (G independent batches, per-group BatchNorm stats)
    or (B, n_in) for a single batch.  prep: output of prepare_params()."""
    n_in, n_hidden, n_out = prep["dims"]
    ni_p, nh_p, no_p = prep["pdims"]
    slab_w = prep["slab"].shape[1]

    squeeze = (x.ndim == 2)
    if squeeze:
        x = x[None]
    G, B, _ = x.shape
    assert B % SUBLANE == 0, "per-group batch must be a multiple of 8 (sublane tile)"

    # Per-call input prep: only pad x's feature dim and cast to bf16.
    x_p = jnp.pad(x, ((0, 0), (0, 0), (0, ni_p - n_in)))
    x_p = x_p.reshape(G * B, ni_p).astype(jnp.bfloat16)

    kernel = functools.partial(_mlp_kernel, nh_p=nh_p, no_p=no_p)

    cost = pl.CostEstimate(
        flops=2 * G * B * (ni_p * nh_p + nh_p * nh_p + nh_p * no_p),
        transcendentals=G * (B * no_p + 2 * nh_p),          # tanh + 2x rsqrt rows
        bytes_accessed=(x_p.size * 2 + prep["w1"].size * 2 + prep["w2"].size * 2
                        + prep["w3"].size * 2 + prep["slab"].size * 4
                        + G * B * no_p * 4),
    )

    out_p = pl.pallas_call(
        kernel,
        out_shape=jax.ShapeDtypeStruct((G * B, no_p), jnp.float32),
        grid=(G,),
        in_specs=[
            pl.BlockSpec((B, ni_p), lambda g: (g, 0)),        # x: blocked per group
            pl.BlockSpec((ni_p, nh_p), lambda g: (0, 0)),     # weights: VMEM-resident
            pl.BlockSpec((nh_p, nh_p), lambda g: (0, 0)),
            pl.BlockSpec((nh_p, no_p), lambda g: (0, 0)),
            pl.BlockSpec((8, slab_w), lambda g: (0, 0)),      # packed bias/BN slab
        ],
        out_specs=pl.BlockSpec((B, no_p), lambda g: (g, 0)),
        compiler_params=pltpu.CompilerParams(
            dimension_semantics=("parallel",)),               # megacore over groups
        cost_estimate=cost,
    )(x_p, prep["w1"], prep["w2"], prep["w3"], prep["slab"])

    out = out_p[:, :n_out].reshape(G, B, n_out)
    return out[0] if squeeze else out


def init_params(key, n_in, n_hidden, n_out):
    """Mimics nn.Linear default init (uniform +-1/sqrt(fan_in)); BN gamma=1, beta=0.
    Weights stored pre-transposed as (in, out)."""
    ks = jax.random.split(key, 6)

    def linear(kw, kb, fan_in, fan_out):
        bound = 1.0 / jnp.sqrt(fan_in)
        w = jax.random.uniform(kw, (fan_in, fan_out), jnp.float32, -bound, bound)
        b = jax.random.uniform(kb, (1, fan_out), jnp.float32, -bound, bound)
        return w, b

    w1, b1 = linear(ks[0], ks[1], n_in, n_hidden)
    w2, b2 = linear(ks[2], ks[3], n_hidden, n_hidden)
    w3, b3 = linear(ks[4], ks[5], n_hidden, n_out)
    return dict(
        w1=w1, b1=b1, g1=jnp.ones((1, n_hidden), jnp.float32), be1=jnp.zeros((1, n_hidden), jnp.float32),
        w2=w2, b2=b2, g2=jnp.ones((1, n_hidden), jnp.float32), be2=jnp.zeros((1, n_hidden), jnp.float32),
        w3=w3, b3=b3,
    )


def reference_forward(x, p):
    """Pure-JAX reference with the same numerics the kernel targets
    (bf16 MXU inputs, f32 accumulation, batch-stat BatchNorm, exact sigmoid).
    x: (B, n_in) — one batch group."""
    def dot_bf16(a, w):
        return jnp.dot(a.astype(jnp.bfloat16), w.astype(jnp.bfloat16),
                       preferred_element_type=jnp.float32)

    def block(h, w, b, g, be):
        h = jnp.maximum(dot_bf16(h, w) + b, 0.0)
        mean = h.mean(0, keepdims=True)
        var = ((h - mean) ** 2).mean(0, keepdims=True)     # biased variance
        return (h - mean) / jnp.sqrt(var + EPS) * g + be

    h = block(x, p["w1"], p["b1"], p["g1"], p["be1"])
    h = block(h, p["w2"], p["b2"], p["g2"], p["be2"])
    z = dot_bf16(h, p["w3"]) + p["b3"]
    return jax.nn.sigmoid(z)


if __name__ == "__main__":
    G, B, N_IN, N_HIDDEN, N_OUT = 4, 8, 32, 32, 16

    key = jax.random.PRNGKey(0)
    kx, kp = jax.random.split(key)
    x = jax.random.normal(kx, (G, B, N_IN), jnp.float32)
    params = init_params(kp, N_IN, N_HIDDEN, N_OUT)

    prep = prepare_params(params)                 # one-time parameter prep
    fwd = jax.jit(lambda xx: mnist_model_forward(xx, prep))

    out = fwd(x)
    out = jax.block_until_ready(out)

    ref = jax.vmap(lambda xg: reference_forward(xg, params))(x)
    assert out.shape == (G, B, N_OUT)
    err = float(jnp.max(jnp.abs(out - ref)))
    assert jnp.allclose(out, ref, atol=2e-3, rtol=2e-3), err

    print("KERNEL_OK")
</pallas_src>

<mosaic_0001>
module attributes {stable_mosaic.version = 11 : i64} {
  func.func @_mlp_kernel(%arg0: i32, %arg1: memref<8x128xbf16, #tpu.memory_space<vmem>>, %arg2: memref<128x128xbf16, #tpu.memory_space<vmem>>, %arg3: memref<128x128xbf16, #tpu.memory_space<vmem>>, %arg4: memref<128x128xbf16, #tpu.memory_space<vmem>>, %arg5: memref<8x128xf32, #tpu.memory_space<vmem>>, %arg6: memref<8x128xf32, #tpu.memory_space<vmem>>) attributes {dimension_semantics = [#tpu.dimension_semantics<parallel>], iteration_bounds = array<i64: 4>, scalar_prefetch = 0 : i64, scratch_operands = 0 : i64, tpu.core_type = #tpu.core_type<tc>, window_params = [{transform_indices = @transform_0, window_bounds = array<i64: 8, 128>}, {pipeline_mode = #tpu.pipeline_mode<synchronous>, transform_indices = @transform_1, window_bounds = array<i64: 128, 128>}, {pipeline_mode = #tpu.pipeline_mode<synchronous>, transform_indices = @transform_2, window_bounds = array<i64: 128, 128>}, {pipeline_mode = #tpu.pipeline_mode<synchronous>, transform_indices = @transform_3, window_bounds = array<i64: 128, 128>}, {pipeline_mode = #tpu.pipeline_mode<synchronous>, transform_indices = @transform_4, window_bounds = array<i64: 8, 128>}, {transform_indices = @transform_5, window_bounds = array<i64: 8, 128>}]} {
    %c0 = arith.constant 0 : index
    %c0_0 = arith.constant 0 : index
    %0 = vector.load %arg5[%c0, %c0_0] : memref<8x128xf32, #tpu.memory_space<vmem>>, vector<8x128xf32>
    %1 = vector.extract_strided_slice %0 {offsets = [0, 0], sizes = [1, 128], strides = [1, 1]} : vector<8x128xf32> to vector<1x128xf32>
    %2 = vector.extract_strided_slice %0 {offsets = [1, 0], sizes = [1, 128], strides = [1, 1]} : vector<8x128xf32> to vector<1x128xf32>
    %3 = vector.extract_strided_slice %0 {offsets = [2, 0], sizes = [1, 128], strides = [1, 1]} : vector<8x128xf32> to vector<1x128xf32>
    %4 = vector.extract_strided_slice %0 {offsets = [3, 0], sizes = [1, 128], strides = [1, 1]} : vector<8x128xf32> to vector<1x128xf32>
    %5 = vector.extract_strided_slice %0 {offsets = [4, 0], sizes = [1, 128], strides = [1, 1]} : vector<8x128xf32> to vector<1x128xf32>
    %6 = vector.extract_strided_slice %0 {offsets = [5, 0], sizes = [1, 128], strides = [1, 1]} : vector<8x128xf32> to vector<1x128xf32>
    %7 = vector.extract_strided_slice %0 {offsets = [6, 0], sizes = [1, 128], strides = [1, 1]} : vector<8x128xf32> to vector<1x128xf32>
    %c0_1 = arith.constant 0 : index
    %c0_2 = arith.constant 0 : index
    %8 = vector.load %arg1[%c0_1, %c0_2] : memref<8x128xbf16, #tpu.memory_space<vmem>>, vector<8x128xbf16>
    %c0_3 = arith.constant 0 : index
    %c0_4 = arith.constant 0 : index
    %9 = vector.load %arg2[%c0_3, %c0_4] : memref<128x128xbf16, #tpu.memory_space<vmem>>, vector<128x128xbf16>
    %cst = arith.constant dense<0.000000e+00> : vector<8x128xf32>
    %10 = tpu.matmul %8, %9, %cst {dimension_numbers = #tpu.dot_dimension_numbers<[1], [0], [0], [1], [0, 0, 1, 1], [], []>} : vector<8x128xbf16>, vector<128x128xbf16>, vector<8x128xf32> -> vector<8x128xf32>
    %11 = vector.broadcast %1 : vector<1x128xf32> to vector<8x128xf32>
    %12 = arith.addf %10, %11 : vector<8x128xf32>
    %cst_5 = arith.constant 0.000000e+00 : f32
    %13 = vector.broadcast %cst_5 : f32 to vector<8x128xf32>
    %14 = arith.maximumf %12, %13 : vector<8x128xf32>
    %cst_6 = arith.constant dense<0.000000e+00> : vector<128xf32>
    %15 = vector.multi_reduction <add>, %14, %cst_6 [0] : vector<8x128xf32> to vector<128xf32>
    %16 = vector.shape_cast %15 : vector<128xf32> to vector<1x128xf32>
    %cst_7 = arith.constant 8.000000e+00 : f32
    %17 = vector.broadcast %cst_7 : f32 to vector<1x128xf32>
    %18 = arith.divf %16, %17 : vector<1x128xf32>
    %19 = vector.broadcast %18 : vector<1x128xf32> to vector<8x128xf32>
    %20 = arith.subf %14, %19 : vector<8x128xf32>
    %21 = arith.mulf %20, %20 : vector<8x128xf32>
    %cst_8 = arith.constant dense<0.000000e+00> : vector<128xf32>
    %22 = vector.multi_reduction <add>, %21, %cst_8 [0] : vector<8x128xf32> to vector<128xf32>
    %23 = vector.shape_cast %22 : vector<128xf32> to vector<1x128xf32>
    %cst_9 = arith.constant 8.000000e+00 : f32
    %24 = vector.broadcast %cst_9 : f32 to vector<1x128xf32>
    %25 = arith.divf %23, %24 : vector<1x128xf32>
    %cst_10 = arith.constant 9.99999974E-6 : f32
    %26 = vector.broadcast %cst_10 : f32 to vector<1x128xf32>
    %27 = arith.addf %25, %26 : vector<1x128xf32>
    %28 = math.rsqrt %27 : vector<1x128xf32>
    %29 = arith.mulf %2, %28 : vector<1x128xf32>
    %30 = vector.broadcast %29 : vector<1x128xf32> to vector<8x128xf32>
    %31 = arith.mulf %20, %30 : vector<8x128xf32>
    %32 = vector.broadcast %3 : vector<1x128xf32> to vector<8x128xf32>
    %33 = arith.addf %31, %32 : vector<8x128xf32>
    %34 = arith.truncf %33 : vector<8x128xf32> to vector<8x128xbf16>
    %c0_11 = arith.constant 0 : index
    %c0_12 = arith.constant 0 : index
    %35 = vector.load %arg3[%c0_11, %c0_12] : memref<128x128xbf16, #tpu.memory_space<vmem>>, vector<128x128xbf16>
    %cst_13 = arith.constant dense<0.000000e+00> : vector<8x128xf32>
    %36 = tpu.matmul %34, %35, %cst_13 {dimension_numbers = #tpu.dot_dimension_numbers<[1], [0], [0], [1], [0, 0, 1, 1], [], []>} : vector<8x128xbf16>, vector<128x128xbf16>, vector<8x128xf32> -> vector<8x128xf32>
    %37 = vector.broadcast %4 : vector<1x128xf32> to vector<8x128xf32>
    %38 = arith.addf %36, %37 : vector<8x128xf32>
    %cst_14 = arith.constant 0.000000e+00 : f32
    %39 = vector.broadcast %cst_14 : f32 to vector<8x128xf32>
    %40 = arith.maximumf %38, %39 : vector<8x128xf32>
    %cst_15 = arith.constant dense<0.000000e+00> : vector<128xf32>
    %41 = vector.multi_reduction <add>, %40, %cst_15 [0] : vector<8x128xf32> to vector<128xf32>
    %42 = vector.shape_cast %41 : vector<128xf32> to vector<1x128xf32>
    %cst_16 = arith.constant 8.000000e+00 : f32
    %43 = vector.broadcast %cst_16 : f32 to vector<1x128xf32>
    %44 = arith.divf %42, %43 : vector<1x128xf32>
    %45 = vector.broadcast %44 : vector<1x128xf32> to vector<8x128xf32>
    %46 = arith.subf %40, %45 : vector<8x128xf32>
    %47 = arith.mulf %46, %46 : vector<8x128xf32>
    %cst_17 = arith.constant dense<0.000000e+00> : vector<128xf32>
    %48 = vector.multi_reduction <add>, %47, %cst_17 [0] : vector<8x128xf32> to vector<128xf32>
    %49 = vector.shape_cast %48 : vector<128xf32> to vector<1x128xf32>
    %cst_18 = arith.constant 8.000000e+00 : f32
    %50 = vector.broadcast %cst_18 : f32 to vector<1x128xf32>
    %51 = arith.divf %49, %50 : vector<1x128xf32>
    %cst_19 = arith.constant 9.99999974E-6 : f32
    %52 = vector.broadcast %cst_19 : f32 to vector<1x128xf32>
    %53 = arith.addf %51, %52 : vector<1x128xf32>
    %54 = math.rsqrt %53 : vector<1x128xf32>
    %55 = arith.mulf %5, %54 : vector<1x128xf32>
    %56 = vector.broadcast %55 : vector<1x128xf32> to vector<8x128xf32>
    %57 = arith.mulf %46, %56 : vector<8x128xf32>
    %58 = vector.broadcast %6 : vector<1x128xf32> to vector<8x128xf32>
    %59 = arith.addf %57, %58 : vector<8x128xf32>
    %60 = arith.truncf %59 : vector<8x128xf32> to vector<8x128xbf16>
    %c0_20 = arith.constant 0 : index
    %c0_21 = arith.constant 0 : index
    %61 = vector.load %arg4[%c0_20, %c0_21] : memref<128x128xbf16, #tpu.memory_space<vmem>>, vector<128x128xbf16>
    %cst_22 = arith.constant dense<0.000000e+00> : vector<8x128xf32>
    %62 = tpu.matmul %60, %61, %cst_22 {dimension_numbers = #tpu.dot_dimension_numbers<[1], [0], [0], [1], [0, 0, 1, 1], [], []>} : vector<8x128xbf16>, vector<128x128xbf16>, vector<8x128xf32> -> vector<8x128xf32>
    %63 = vector.broadcast %7 : vector<1x128xf32> to vector<8x128xf32>
    %64 = arith.addf %62, %63 : vector<8x128xf32>
    %cst_23 = arith.constant 5.000000e-01 : f32
    %65 = vector.broadcast %cst_23 : f32 to vector<8x128xf32>
    %66 = arith.mulf %65, %64 : vector<8x128xf32>
    %67 = math.tanh %66 : vector<8x128xf32>
    %cst_24 = arith.constant 5.000000e-01 : f32
    %68 = vector.broadcast %cst_24 : f32 to vector<8x128xf32>
    %69 = arith.mulf %68, %67 : vector<8x128xf32>
    %cst_25 = arith.constant 5.000000e-01 : f32
    %70 = vector.broadcast %cst_25 : f32 to vector<8x128xf32>
    %71 = arith.addf %69, %70 : vector<8x128xf32>
    %c0_26 = arith.constant 0 : index
    %c0_27 = arith.constant 0 : index
    %72 = vector.load %arg6[%c0_26, %c0_27] : memref<8x128xf32, #tpu.memory_space<vmem>>, vector<8x128xf32>
    tpu.vector_store %arg6[%c0_26, %c0_27], %71 {strides = array<i32>} : memref<8x128xf32, #tpu.memory_space<vmem>>, vector<8x128xf32>,
    return
  }
  func.func @transform_0(%arg0: i32) -> (i32, i32) {
    %c0_i32 = arith.constant 0 : i32
    %c0_i32_0 = arith.constant 0 : i32
    return %arg0, %c0_i32 : i32, i32
  }
  func.func @transform_1(%arg0: i32) -> (i32, i32) {
    %c0_i32 = arith.constant 0 : i32
    %c0_i32_0 = arith.constant 0 : i32
    %c0_i32_1 = arith.constant 0 : i32
    return %c0_i32, %c0_i32_0 : i32, i32
  }
  func.func @transform_2(%arg0: i32) -> (i32, i32) {
    %c0_i32 = arith.constant 0 : i32
    %c0_i32_0 = arith.constant 0 : i32
    %c0_i32_1 = arith.constant 0 : i32
    return %c0_i32, %c0_i32_0 : i32, i32
  }
  func.func @transform_3(%arg0: i32) -> (i32, i32) {
    %c0_i32 = arith.constant 0 : i32
    %c0_i32_0 = arith.constant 0 : i32
    %c0_i32_1 = arith.constant 0 : i32
    return %c0_i32, %c0_i32_0 : i32, i32
  }
  func.func @transform_4(%arg0: i32) -> (i32, i32) {
    %c0_i32 = arith.constant 0 : i32
    %c0_i32_0 = arith.constant 0 : i32
    %c0_i32_1 = arith.constant 0 : i32
    return %c0_i32, %c0_i32_0 : i32, i32
  }
  func.func @transform_5(%arg0: i32) -> (i32, i32) {
    %c0_i32 = arith.constant 0 : i32
    %c0_i32_0 = arith.constant 0 : i32
    return %arg0, %c0_i32 : i32, i32
  }
}

</mosaic_0001>

<bundles_post_ra>
// kernel: _lambda_.1
= control target key start
LH: loop header
LB: loop body
LE: loop exit
PB: predicated region body
PF: predicated region fallthrough
CT: control target
= control target key end

     0   :  { %10 = vsyncpa [#allocation3], 0  ;;  %s1152_s0 = inlined_call_operand.vmem [shape: bf16[32,128], index: 0, kind: input, shape index: {}]   ;;  %s1153_s1 = inlined_call_operand.hbm [shape: bf16[128,128], index: 1, kind: input, shape index: {}]   ;;  %s1154_s2 = inlined_call_operand.hbm [shape: bf16[128,128], index: 2, kind: input, shape index: {}]   ;;  %s1155_s3 = inlined_call_operand.vmem [shape: bf16[128,128], index: 3, kind: input, shape index: {}]   ;;  %s1156_s4 = inlined_call_operand.vmem [shape: f32[8,128], index: 4, kind: input, shape index: {}]   ;;  %s1157_s5 = inlined_call_operand.vmem [shape: f32[32,128], index: 5, kind: output, shape index: {}]  }
   0x1   :  { %11 = vsyncpa [#allocation5], 0  ;;  %s1011_s18 = smov 0  }
   0x2 LB: > { %s1017_s19 = sadd.s32 4294967295, %s973_s18   ;;  %p722_p0 = scmp.ge.s32.totalorder %s973_s18, 1  ;;  %s973_s18 = sphi %s1011_s18, %s17_s18  }
   0x3   : > { %p158_p1 = scmp.lt.s32.totalorder %s973_s18, 5  ;;  %s975_s20 = smov [#allocation2]  }
   0x4   : > { %s170_s21 = sshll.u32 %s975_s20, 4  ;;  %p859_p3 = scmp.eq.s32.totalorder %s1017_s19, 0  ;;  %s171_s21 = int_to_ptr.vmem [resolvable:$true] %s170_s21 }
   0x5   : > { %p1021_p2 = pnand %p722_p0, %p158_p1  ;;  %s976_s23 = smov [#allocation4]  }
   0x6   : > { %s183_s24 = sshll.u32 %s976_s23, 4  ;;  %s918_s26 = scalar_lea.vmem %s171_s21, 1024  ;;  %s184_s24 = int_to_ptr.vmem [resolvable:$true] %s183_s24 }
   0x7   : > { %p852_p4 = pneg %p1021_p2  ;;  %p919_p7 = scmp.ne.s32.totalorder %s171_s21, %s918_s26 }
   0x8   : > { %p926_p10 = scmp.lt.s32.totalorder %s171_s21, %s171_s21  ;;  %p927_p11 = scmp.lt.s32.totalorder %s918_s26, %s918_s26 }
   0x9   : > { %p1030_p5 = pnand %p859_p3, %p852_p4 }
   0xa   : > { %p928_p12 = por %p927_p11, %p926_p10 }
   0xb   : > { %p909_p6 = pneg %p1030_p5 }
   0xd   : > { %p921_p8 = pnand %p919_p7, %p909_p6 }
   0xf   : > { %p922_p9 = pneg %p921_p8 }
  0x11   : > { %p929_p13 = pnand %p928_p12, %p922_p9 }
  0x13   : > { %932 = shalt.err (!%p929_p13)
}
  0x14   : > { %s977_s27 = smov 64   ;;  %s978_s28 = smov 4  }
  0x15   : > { %855 = dma.hbm_to_vmem [thread:$0]  (!%p1030_p5), %s1153_s1, 1024, %s171_s21, [#allocation3], %s977_s27, %s977_s27, %s978_s28  }
  0x16   : > { %s944_s6 = scalar_lea.vmem %s184_s24, 1024  ;;  %p952_p7 = scmp.lt.s32.totalorder %s184_s24, %s184_s24 }
  0x17   : > { %p945_p0 = scmp.ne.s32.totalorder %s184_s24, %s944_s6  ;;  %p953_p8 = scmp.lt.s32.totalorder %s944_s6, %s944_s6 }
  0x19   : > { %p947_p1 = pnand %p945_p0, %p909_p6  ;;  %p954_p10 = por %p953_p8, %p952_p7 }
  0x1b   : > { %p948_p4 = pneg %p947_p1 }
  0x1d   : > { %p955_p9 = pnand %p954_p10, %p948_p4 }
  0x1f   : > { %958 = shalt.err (!%p955_p9)
}
  0x20   : > { %858 = dma.hbm_to_vmem [thread:$0]  (!%p1030_p5), %s1154_s2, 1024, %s184_s24, [#allocation5], %s977_s27, %s977_s27, %s978_s28  }
  0x21   : > { %212 = sbr.rel (%p1021_p2) target bundleno = 801 (0x321), region = 40 }
  0x26   : > { %964 = dma.done.wait (%p859_p3), [#allocation3], 1024  }
  0x27   : > { %966 = vsyncadd (%p859_p3), [#allocation3], 4294966272 }
  0x28   : > { %968 = dma.done.wait (%p859_p3), [#allocation5], 1024  }
  0x29   : > { %970 = vsyncadd (%p859_p3), [#allocation5], 4294966272  ;;  %v979_v0 = vmov 0.0   ;;  %vm980_vm0 = vmmov 0   ;;  %v877_v1 = vld [vmem:[#allocation2 + $0x38] sm:$0xff]   ;;  %v878_v2 = vld [vmem:[#allocation2 + $0x30] sm:$0xff]   ;;  %v269_v18 = vlaneseq }
  0x2a   : > { %784 = vmatprep.subr.bf16.mxu0 %v979_v0  ;;  %800 = vmatprep.mubr.msk.bf16.mxu0 %vm980_vm0, %v979_v0  ;;  %v879_v3 = vld [vmem:[#allocation2 + $0x28] sm:$0xff]   ;;  %v880_v4 = vld [vmem:[#allocation2 + $0x20] sm:$0xff]   ;;  %p242_p2 = scmp.lt.s32.totalorder %s1017_s19, 3  ;;  %v881_v5 = vld [vmem:[#allocation2 + $0x18] sm:$0xff]  }
  0x2b   : > { %804 = vmatprep.subr.bf16.mxu1 %v979_v0  ;;  %820 = vmatprep.mubr.msk.bf16.mxu1 %vm980_vm0, %v979_v0  ;;  %v882_v6 = vld [vmem:[#allocation2 + $0x10] sm:$0xff]   ;;  %v883_v7 = vld [vmem:[#allocation2 + $0x8] sm:$0xff]   ;;  %v884_v8 = vld [vmem:[#allocation2] sm:$0xff]   ;;  %v1093_v19 = vshrl.u32 %v269_v18, 7 }
  0x2c   : > { %785 = vmatpush3.bf16.msra.mxu0 %v877_v1  ;;  %s1161_s19 = smov (!%p242_p2, %s1017_s19), 3  ;;  %v885_v10 = vld [vmem:[#allocation4 + $0x38] sm:$0xff]   ;;  %v886_v11 = vld [vmem:[#allocation4 + $0x30] sm:$0xff]   ;;  %v887_v12 = vld [vmem:[#allocation4 + $0x28] sm:$0xff]  }
  0x2d   : > { %786 = vmatprep.subr.bf16.mxu0 %v979_v0  ;;  %s729_s9 = sshll.u32 %s1161_s19, 2  ;;  %805 = vmatpush3.bf16.msra.mxu1 %v885_v10  ;;  %v888_v13 = vld [vmem:[#allocation4 + $0x20] sm:$0xff]   ;;  %v889_v14 = vld [vmem:[#allocation4 + $0x18] sm:$0xff]   ;;  %v890_v15 = vld [vmem:[#allocation4 + $0x10] sm:$0xff]   ;;  %v271_v20 = vsub.s32 0, %v1093_v19  ;;  %v384_v46 = vsub.s32 1, %v1093_v19 }
  0x2e   : > { %s245_s12 = scalar_lea.vmem %s1152_s0, %s729_s9  ;;  %806 = vmatprep.subr.bf16.mxu1 %v979_v0  ;;  %v891_v16 = vld [vmem:[#allocation4 + $0x8] sm:$0xff]   ;;  %v892_v17 = vld [vmem:[#allocation4] sm:$0xff]   ;;  %v389_v47 = vsub.s32 2, %v1093_v19  ;;  %v893_v55 = vld [vmem:[%s1155_s3 + $0x38] sm:$0xff]   ;;  %v411_v63 = vsub.s32 3, %v1093_v19  ;;  %s730_s8 = sshll.u32 %s1161_s19, 3 }
  0x2f   : > { %v252_v9 = vld [vmem:[%s245_s12] sm:$0xf]  ;;  %v894_v56 = vld [vmem:[%s1155_s3 + $0x30] sm:$0xff]   ;;  %v895_v57 = vld [vmem:[%s1155_s3 + $0x28] sm:$0xff]   ;;  %s249_s11 = scalar_lea.vmem %s1157_s5, %s730_s8 }
  0x30   : > { %787 = vmatpush3.bf16.msra.mxu0 %v878_v2  ;;  %v1099_v21 = vld [vmem:[%s1156_s4] sm:$0xff]  ;;  %v897_v59 = vld [vmem:[%s1155_s3 + $0x18] sm:$0xff]   ;;  %v898_v60 = vld [vmem:[%s1155_s3 + $0x10] sm:$0xff]  }
  0x31   : > { %788 = vmatprep.subr.bf16.mxu0 %v979_v0  ;;  %807 = vmatpush3.bf16.msra.mxu1 %v886_v11  ;;  %v272_v22 = vrot.slane %v1099_v21, %v271_v20  ;;  %v390_v51 = vrot.slane %v1099_v21, %v389_v47  ;;  %v896_v58 = vld [vmem:[%s1155_s3 + $0x20] sm:$0xff]   ;;  %v899_v61 = vld [vmem:[%s1155_s3 + $0x8] sm:$0xff]   ;;  %v412_v1 = vrot.slane %v1099_v21, %v411_v63 }
  0x32   : > { %808 = vmatprep.subr.bf16.mxu1 %v979_v0  ;;  %v900_v62 = vld [vmem:[%s1155_s3] sm:$0xff]  }
  0x34   : > { %789 = vmatpush3.bf16.msra.mxu0 %v879_v3 }
  0x35   : > { %790 = vmatprep.subr.bf16.mxu0 %v979_v0  ;;  %809 = vmatpush3.bf16.msra.mxu1 %v887_v12 }
  0x36   : > { %810 = vmatprep.subr.bf16.mxu1 %v979_v0 }
  0x38   : > { %791 = vmatpush3.bf16.msra.mxu0 %v880_v4 }
  0x39   : > { %792 = vmatprep.subr.bf16.mxu0 %v979_v0  ;;  %811 = vmatpush3.bf16.msra.mxu1 %v888_v13 }
  0x3a   : > { %812 = vmatprep.subr.bf16.mxu1 %v979_v0 }
  0x3c   : > { %793 = vmatpush3.bf16.msra.mxu0 %v881_v5 }
  0x3d   : > { %794 = vmatprep.subr.bf16.mxu0 %v979_v0  ;;  %813 = vmatpush3.bf16.msra.mxu1 %v889_v14 }
  0x3e   : > { %814 = vmatprep.subr.bf16.mxu1 %v979_v0 }
  0x40   : > { %795 = vmatpush3.bf16.msra.mxu0 %v882_v6 }
  0x41   : > { %796 = vmatprep.subr.bf16.mxu0 %v979_v0  ;;  %815 = vmatpush3.bf16.msra.mxu1 %v890_v15 }
  0x42   : > { %816 = vmatprep.subr.bf16.mxu1 %v979_v0 }
  0x44   : > { %797 = vmatpush3.bf16.msra.mxu0 %v883_v7 }
  0x45   : > { %798 = vmatprep.subr.bf16.mxu0 %v979_v0  ;;  %817 = vmatpush3.bf16.msra.mxu1 %v891_v16 }
  0x46   : > { %818 = vmatprep.subr.bf16.mxu1 %v979_v0 }
  0x48   : > { %799 = vmatpush3.bf16.msra.mxu0 %v884_v8 }
  0x49   : > { %824 = vmatprep.subr.bf16.mxu0 %v979_v0  ;;  %819 = vmatpush3.bf16.msra.mxu1 %v892_v17 }
  0x4b   : > { %801 = vmatmul.mubr.bf16.vlgmr.msra.gmra.mxu0 %v252_v9 }
  0x4c   : > { %840 = vmatprep.mubr.msk.bf16.mxu0 %vm980_vm0, %v979_v0  ;;  %825 = vmatpush3.bf16.msra.mxu0 %v893_v55 }
  0x4d   : > { %826 = vmatprep.subr.bf16.mxu0 %v979_v0 }
  0x50   : > { %827 = vmatpush3.bf16.msra.mxu0 %v894_v56 }
  0x51   : > { %828 = vmatprep.subr.bf16.mxu0 %v979_v0 }
  0x54   : > { %829 = vmatpush3.bf16.msra.mxu0 %v895_v57 }
  0x55   : > { %830 = vmatprep.subr.bf16.mxu0 %v979_v0 }
  0x58   : > { %831 = vmatpush3.bf16.msra.mxu0 %v896_v58 }
  0x59   : > { %832 = vmatprep.subr.bf16.mxu0 %v979_v0 }
  0x5c   : > { %833 = vmatpush3.bf16.msra.mxu0 %v897_v59 }
  0x5d   : > { %834 = vmatprep.subr.bf16.mxu0 %v979_v0 }
  0x60   : > { %835 = vmatpush3.bf16.msra.mxu0 %v898_v60 }
  0x61   : > { %836 = vmatprep.subr.bf16.mxu0 %v979_v0 }
  0x64   : > { %837 = vmatpush3.bf16.msra.mxu0 %v899_v61 }
  0x65   : > { %838 = vmatprep.subr.bf16.mxu0 %v979_v0 }
  0x68   : > { %839 = vmatpush3.bf16.msra.mxu0 %v900_v62 }
 0x10b   : > { %v355_v23 = vpop.f32.mrf.mxu0 }
 0x10c   : > { %v356_v24 = vadd.f32 %v355_v23, %v272_v22 }
 0x10d   : > { %v802_v25 = vpop.f32.mrf.mxu0 }
 0x10e   : > { %v361_v26 = vmax.f32 %v356_v24, 0.0 }
 0x10f   : > { %v358_v27 = vpop.f32.mrf.mxu0 }
 0x110   : > { %v362_v28 = vrot.slane %v361_v26, 4  ;;  %v528_v27 = vsub.s32 5, %v1093_v19 }
 0x111   : > { %v803_v29 = vpop.f32.mrf.mxu0 }
 0x112   : > { %v363_v30 = vadd.f32 %v362_v28, %v361_v26 }
 0x114   : > { %v364_v31 = vrot.slane %v363_v30, 2 }
 0x116   : > { %v365_v32 = vadd.f32 %v364_v31, %v363_v30  ;;  %v529_v31 = vrot.slane %v1099_v21, %v528_v27 }
 0x118   : > { %v366_v33 = vrot.slane %v365_v32, 1 }
 0x11a   : > { %v367_v34 = vadd.f32 %v366_v33, %v365_v32 }
 0x11c   : > { %v369_v35 = vmul.f32 0.125, %v367_v34 }
 0x11e   : > { %v370_v36 = vsub.f32 %v361_v26, %v369_v35  ;;  %v523_v26 = vsub.s32 4, %v1093_v19  ;;  %v550_v35 = vsub.s32 6, %v1093_v19 }
 0x120   : > { %v371_v37 = vmul.f32 %v370_v36, %v370_v36 }
 0x122   : > { %v372_v38 = vrot.slane %v371_v37, 4 }
 0x124   : > { %v373_v39 = vadd.f32 %v372_v38, %v371_v37 }
 0x126   : > { %v374_v40 = vrot.slane %v373_v39, 2 }
 0x128   : > { %v375_v41 = vadd.f32 %v374_v40, %v373_v39 }
 0x12a   : > { %v376_v42 = vrot.slane %v375_v41, 1 }
 0x12c   : > { %v377_v43 = vadd.f32 %v376_v42, %v375_v41 }
 0x12e   : > { %v378_v44 = vmul.f32 0.125, %v377_v43 }
 0x130   : > { %v379_v45 = vadd.f32 1e-05, %v378_v44 }
 0x132   : > { %901 = vrsqrt.f32 %v379_v45 }
 0x13f   : > { %v902_v48 = vpop.eup %901 }
 0x140   : > { %v381_v49 = vmul.f32 %v902_v48, %v1099_v21 }
 0x142   : > { %v385_v50 = vrot.slane %v381_v49, %v384_v46 }
 0x144   : > { %v386_v52 = vmul.f32 %v385_v50, %v370_v36  ;;  %v551_v36 = vrot.slane %v1099_v21, %v550_v35 }
 0x146   : > { %v391_v53 = vadd.f32 %v390_v51, %v386_v52 }
 0x148   : > { %v392_v54 = vpack.c.bf16 %v391_v53, %v391_v53 }
 0x14a   : > { %821 = vmatmul.mubr.bf16.vlgmr.msra.gmra.mxu1 %v392_v54 }
 0x20a   : > { %v495_v2 = vpop.f32.mrf.mxu1 }
 0x20b   : > { %v496_v3 = vadd.f32 %v495_v2, %v412_v1 }
 0x20c   : > { %v822_v4 = vpop.f32.mrf.mxu1 }
 0x20d   : > { %v501_v5 = vmax.f32 %v496_v3, 0.0 }
 0x20e   : > { %v498_v6 = vpop.f32.mrf.mxu1 }
 0x20f   : > { %v502_v7 = vrot.slane %v501_v5, 4 }
 0x210   : > { %v823_v8 = vpop.f32.mrf.mxu1 }
 0x211   : > { %v503_v9 = vadd.f32 %v502_v7, %v501_v5 }
 0x213   : > { %v504_v10 = vrot.slane %v503_v9, 2 }
 0x215   : > { %v505_v11 = vadd.f32 %v504_v10, %v503_v9 }
 0x217   : > { %v506_v0 = vrot.slane %v505_v11, 1 }
 0x219   : > { %v507_v12 = vadd.f32 %v506_v0, %v505_v11 }
 0x21b   : > { %v508_v13 = vmul.f32 0.125, %v507_v12 }
 0x21d   : > { %v509_v14 = vsub.f32 %v501_v5, %v508_v13 }
 0x21f   : > { %v510_v15 = vmul.f32 %v509_v14, %v509_v14 }
 0x221   : > { %v511_v16 = vrot.slane %v510_v15, 4 }
 0x223   : > { %v512_v17 = vadd.f32 %v511_v16, %v510_v15 }
 0x225   : > { %v513_v18 = vrot.slane %v512_v17, 2 }
 0x227   : > { %v514_v20 = vadd.f32 %v513_v18, %v512_v17 }
 0x229   : > { %v515_v22 = vrot.slane %v514_v20, 1 }
 0x22b   : > { %v516_v23 = vadd.f32 %v515_v22, %v514_v20 }
 0x22d   : > { %v517_v24 = vmul.f32 0.125, %v516_v23 }
 0x22f   : > { %v518_v25 = vadd.f32 1e-05, %v517_v24 }
 0x231   : > { %903 = vrsqrt.f32 %v518_v25 }
 0x23e   : > { %v904_v28 = vpop.eup %903 }
 0x23f   : > { %v520_v29 = vmul.f32 %v904_v28, %v1099_v21 }
 0x241   : > { %v524_v30 = vrot.slane %v520_v29, %v523_v26 }
 0x243   : > { %v525_v32 = vmul.f32 %v524_v30, %v509_v14 }
 0x245   : > { %v530_v33 = vadd.f32 %v529_v31, %v525_v32 }
 0x247   : > { %v531_v34 = vpack.c.bf16 %v530_v33, %v530_v33 }
 0x249   : > { %841 = vmatmul.mubr.bf16.vlgmr.msra.gmra.mxu0 %v531_v34 }
 0x309   : > { %v634_v37 = vpop.f32.mrf.mxu0 }
 0x30a   : > { %v635_v38 = vadd.f32 %v634_v37, %v551_v36 }
 0x30b   : > { %v842_v39 = vpop.f32.mrf.mxu0 }
 0x30c   : > { %v640_v40 = vmul.f32 0.5, %v635_v38 }
 0x30d   : > { %v637_v41 = vpop.f32.mrf.mxu0 }
 0x30e   : > { %905 = vtanh.f32 %v640_v40 }
 0x30f   : > { %v843_v42 = vpop.f32.mrf.mxu0 }
 0x31b   : > { %v906_v43 = vpop.eup %905 }
 0x31c   : > { %v642_v44 = vmul.f32 0.5, %v906_v43 }
 0x31e   : > { %v643_v45 = vadd.f32 0.5, %v642_v44 }
 0x320   : > { %644 = vst [vmem:[%s249_s11] sm:$0xff] %v643_v45 }
 0x321 PF: > { %s17_s18 = sadd.s32 1, %s973_s18  }
 0x322   : > { %p14_p3 = scmp.ge.s32.totalorder %s17_s18, 6  }
 0x324   :  { %16 = sbr.rel (!%p14_p3) target bundleno = 2 (0x2), region = 79 }
 0x329   :  { %664 = vsyncpa [#allocation3], 1 }
 0x32a   :  { %666 = vsyncpa [#allocation3 + $0x1], 1 }
 0x32b   :  { %667 = vsyncpa [#allocation5], 1 }

</bundles_post_ra>
